<compile_context>
chip_gen: v7x
topology: tpu7x:2x2x1
jax: 0.10.0
libtpu: 0.0.40
codegen_flags: <defaults>
</compile_context>

<pallas_src>
import functools
import math

import jax
import jax.numpy as jnp
from jax.experimental import pallas as pl
from jax.experimental.pallas import tpu as pltpu

_STAT_SUBLANES = 8      # stats block sublane dim (full sublane tile -> no layout risk)
_STAT_LANE_ALIGN = 128  # stats block lane alignment


def _round_up(x, m):
    return (x + m - 1) // m * m


def _moe_kernel(x_ref, wg_ref, down_ref, up_ref,        # inputs
                out_ref, stats_ref,                     # outputs
                *, num_experts, d_pad, n_tokens, block_n):
    i = pl.program_id(0)

    x = x_ref[...]                                       # (TN, H), input/compute dtype

    # ---- DenseGate: logits + softmax in fp32 ------------------------------------
    logits = jnp.dot(x.astype(jnp.float32), wg_ref[...],
                     preferred_element_type=jnp.float32)             # (TN, E)
    m = jnp.max(logits, axis=1, keepdims=True)
    ex = jnp.exp(logits - m)
    gates = ex / jnp.sum(ex, axis=1, keepdims=True)                  # (TN, E) fp32

    # ---- per-tile l_aux statistics (final reduction done in the wrapper so the
    #      token axis stays 'parallel'; padded rows masked out) -------------------
    row = i * block_n + jax.lax.broadcasted_iota(jnp.int32, (block_n, 1), 0)
    valid = (row < n_tokens).astype(jnp.float32)                     # (TN, 1)

    gsum = jnp.sum(gates * valid, axis=0, keepdims=True)             # (1, E)
    plogp = gates * jnp.log(jnp.clip(gates, 1e-12, 1.0))             # (TN, E)
    esum = -jnp.sum(plogp * valid)                                   # scalar: sum of entropies

    stat_lanes = stats_ref.shape[-1]
    row0 = gsum
    if stat_lanes > num_experts:                                     # static pad to lane width
        row0 = jnp.concatenate(
            [row0, jnp.zeros((1, stat_lanes - num_experts), jnp.float32)], axis=1)
    row1 = jnp.full((1, stat_lanes), esum, dtype=jnp.float32)
    rest = jnp.zeros((_STAT_SUBLANES - 2, stat_lanes), jnp.float32)
    stats_ref[0] = jnp.concatenate([row0, row1, rest], axis=0)       # (8, stat_lanes)

    # ---- fused down projection + SiLU (dropout p=0 is identity) -----------------
    inter = jnp.dot(x, down_ref[...], preferred_element_type=jnp.float32)   # (TN, E*Dp) f32
    inter = inter * jax.nn.sigmoid(inter)                                   # silu

    # ---- weighted up projection as ONE matmul:
    #      out = (gates broadcast over Dp * inter) @ up_flat,  up_flat:(E*Dp, H) ---
    scale = jnp.repeat(gates, d_pad, axis=1)                                # (TN, E*Dp) f32
    weighted = (inter * scale).astype(x.dtype)
    out = jnp.dot(weighted, up_ref[...], preferred_element_type=jnp.float32)
    out_ref[...] = out.astype(out_ref.dtype)


def dense_mask_moe(hidden_states, wg_w, expert_down_w, expert_up_w,
                   *, num_experts, expert_dim, block_n=256, vmem_limit_bytes=None):
    """hidden_states: [..., H].  wg_w: [E, H].  expert_down_w: [E, H*D].
    expert_up_w: [E, D*H].  Returns (output like hidden_states, l_aux scalar, None)."""
    orig_shape = hidden_states.shape
    H = orig_shape[-1]
    E, D = num_experts, expert_dim

    x = hidden_states.reshape(-1, H)
    compute_dtype = x.dtype
    N = x.shape[0]

    # --- token tiling: block_n rows per grid step (pad N with zero rows, masked) --
    tn = max(8, min(int(block_n), _round_up(N, 8)))
    tn = _round_up(tn, 8)
    n_pad = _round_up(N, tn)
    num_tiles = n_pad // tn
    if n_pad != N:
        x = jnp.concatenate([x, jnp.zeros((n_pad - N, H), compute_dtype)], axis=0)

    # --- pad per-expert dim D so the fused lane/contraction dim E*Dp % 128 == 0 ---
    d_align = 128 // math.gcd(E, 128)
    Dp = _round_up(D, d_align)
    EDp = E * Dp

    # --- weight prep (plain JAX glue, mirrors the PyTorch module) -----------------
    wg_t = jnp.asarray(wg_w, jnp.float32).T                             # (H, E) fp32 gate

    down = jnp.asarray(expert_down_w, compute_dtype).reshape(E, H, D)
    if Dp != D:
        down = jnp.pad(down, ((0, 0), (0, 0), (0, Dp - D)))
    fused_down = down.transpose(1, 0, 2).reshape(H, EDp)                # (H, E*Dp)

    up = jnp.asarray(expert_up_w, compute_dtype).reshape(E, D, H)
    if Dp != D:
        up = jnp.pad(up, ((0, 0), (0, Dp - D), (0, 0)))
    up_flat = up.reshape(EDp, H)                                        # (E*Dp, H)

    stat_lanes = _round_up(E, _STAT_LANE_ALIGN)

    # --- explicit VMEM budget ------------------------------------------------------
    if vmem_limit_bytes is None:
        itm = jnp.dtype(compute_dtype).itemsize
        est = (2 * tn * H * itm                       # x tiles (double-buffered)
               + 2 * tn * H * itm                     # out tiles
               + 2 * H * E * 4                        # gate weight
               + 2 * (H * EDp + EDp * H) * itm        # fused weights (resident)
               + 2 * num_tiles and 2 * _STAT_SUBLANES * stat_lanes * 4
               + 2 * tn * EDp * 4)                    # intermediate headroom
        vmem_limit_bytes = int(min(max(2 * est, 8 * 2 ** 20), 100 * 2 ** 20))
    # TODO(synk): on v7x (64 MiB VMEM) with large H*E*D, stream fused_down/up_flat over a
    # second 'arbitrary' grid axis (K-chunks + fp32 accumulator) instead of keeping them resident.

    kernel = functools.partial(_moe_kernel, num_experts=E, d_pad=Dp,
                               n_tokens=N, block_n=tn)

    out, stats = pl.pallas_call(
        kernel,
        out_shape=(
            jax.ShapeDtypeStruct((n_pad, H), compute_dtype),
            jax.ShapeDtypeStruct((num_tiles, _STAT_SUBLANES, stat_lanes), jnp.float32),
        ),
        grid_spec=pltpu.PrefetchScalarGridSpec(
            num_scalar_prefetch=0,
            grid=(num_tiles,),
            in_specs=[
                pl.BlockSpec((tn, H), lambda i: (i, 0)),            # x tile
                pl.BlockSpec((H, E), lambda i: (0, 0)),             # gate weight (resident)
                pl.BlockSpec((H, EDp), lambda i: (0, 0)),           # fused down (resident)
                pl.BlockSpec((EDp, H), lambda i: (0, 0)),           # fused up   (resident)
            ],
            out_specs=(
                pl.BlockSpec((tn, H), lambda i: (i, 0)),            # output tile
                pl.BlockSpec((1, _STAT_SUBLANES, stat_lanes),
                             lambda i: (i, 0, 0)),                  # per-tile l_aux stats
            ),
        ),
        compiler_params=pltpu.CompilerParams(
            dimension_semantics=("parallel",),       # no cross-step state -> megacore-safe
            vmem_limit_bytes=vmem_limit_bytes),
    )(x, wg_t, fused_down, up_flat)

    # ---- finalize mutual-information loss from per-tile partial sums -------------
    sum_g = jnp.sum(stats[:, 0, :E], axis=0)          # (E,)  sum over tokens of gates
    ent_sum = jnp.sum(stats[:, 1, 0])                 # scalar: sum of per-token entropies
    avg_g = sum_g / N
    p = jnp.clip(avg_g, 1e-12, 1.0)
    ent_avg = -jnp.sum(p * jnp.log(p))
    l_aux = ent_avg - ent_sum / N

    out = out[:N].reshape(orig_shape)
    return out, l_aux, None                            # exp_counts is None (dense gating)


def reference_moe(hidden_states, wg_w, expert_down_w, expert_up_w, *, num_experts, expert_dim):
    """Pure-JAX reference mirroring the PyTorch forward (dense_gating)."""
    orig_shape = hidden_states.shape
    H = orig_shape[-1]
    E, D = num_experts, expert_dim
    x = hidden_states.reshape(-1, H).astype(jnp.float32)
    logits = x @ wg_w.astype(jnp.float32).T
    gates = jax.nn.softmax(logits, axis=1)
    avg = jnp.mean(gates, axis=0)
    p = jnp.clip(avg, 1e-12, 1.0)
    ent_avg = -jnp.sum(p * jnp.log(p))
    ent_per = -jnp.sum(gates * jnp.log(jnp.clip(gates, 1e-12, 1.0)), axis=1)
    l_aux = ent_avg - jnp.mean(ent_per)
    fused_down = expert_down_w.reshape(E, H, D).transpose(1, 0, 2).reshape(H, E * D)
    inter = (x @ fused_down).reshape(-1, E, D)
    inter = jax.nn.silu(inter)
    up = expert_up_w.reshape(E, D, H)
    out = jnp.einsum('ne,ned,edh->nh', gates, inter, up)
    return out.reshape(orig_shape), l_aux


if __name__ == "__main__":
    # Small shapes consistent with the module: batch=2, seq=8, hidden=32,
    # expert_dim=16, num_experts=4 (k unused for dense_gating).
    B, S, H, D, E = 2, 8, 32, 16, 4
    key = jax.random.PRNGKey(0)
    k0, k1, k2, k3 = jax.random.split(key, 4)

    hidden_states = jax.random.normal(k0, (B, S, H), dtype=jnp.float32)
    wg_w = jax.random.normal(k1, (E, H), dtype=jnp.float32) * (1.0 / jnp.sqrt(H))
    expert_down_w = jax.random.normal(k2, (E, H * D), dtype=jnp.float32) * jnp.sqrt(2.0 / (H + D))
    expert_up_w = jax.random.normal(k3, (E, D * H), dtype=jnp.float32) * jnp.sqrt(1.0 / H)

    out, l_aux, exp_counts = dense_mask_moe(
        hidden_states, wg_w, expert_down_w, expert_up_w,
        num_experts=E, expert_dim=D)
    out = jax.block_until_ready(out)
    l_aux = jax.block_until_ready(l_aux)

    ref_out, ref_laux = reference_moe(
        hidden_states, wg_w, expert_down_w, expert_up_w,
        num_experts=E, expert_dim=D)

    assert out.shape == hidden_states.shape
    assert out.dtype == hidden_states.dtype
    assert jnp.allclose(out, ref_out, atol=2e-2, rtol=2e-2), "output mismatch"
    assert jnp.allclose(l_aux, ref_laux, atol=1e-3, rtol=1e-3), "l_aux mismatch"
    assert exp_counts is None

    print("KERNEL_OK")
</pallas_src>

<mosaic_0001>
module attributes {stable_mosaic.version = 11 : i64} {
  func.func @_moe_kernel(%arg0: i32, %arg1: memref<16x32xf32, #tpu.memory_space<vmem>>, %arg2: memref<32x4xf32, #tpu.memory_space<vmem>>, %arg3: memref<32x128xf32, #tpu.memory_space<vmem>>, %arg4: memref<128x32xf32, #tpu.memory_space<vmem>>, %arg5: memref<16x32xf32, #tpu.memory_space<vmem>>, %arg6: memref<1x8x128xf32, #tpu.memory_space<vmem>>) attributes {dimension_semantics = [#tpu.dimension_semantics<parallel>], iteration_bounds = array<i64: 1>, scalar_prefetch = 0 : i64, scratch_operands = 0 : i64, tpu.core_type = #tpu.core_type<tc>, window_params = [{transform_indices = @transform_0, window_bounds = array<i64: 16, 32>}, {pipeline_mode = #tpu.pipeline_mode<synchronous>, transform_indices = @transform_1, window_bounds = array<i64: 32, 4>}, {pipeline_mode = #tpu.pipeline_mode<synchronous>, transform_indices = @transform_2, window_bounds = array<i64: 32, 128>}, {pipeline_mode = #tpu.pipeline_mode<synchronous>, transform_indices = @transform_3, window_bounds = array<i64: 128, 32>}, {transform_indices = @transform_4, window_bounds = array<i64: 16, 32>}, {transform_indices = @transform_5, window_bounds = array<i64: 1, 8, 128>}]} {
    %c0 = arith.constant 0 : index
    %c0_0 = arith.constant 0 : index
    %0 = vector.load %arg1[%c0, %c0_0] : memref<16x32xf32, #tpu.memory_space<vmem>>, vector<16x32xf32>
    %c0_1 = arith.constant 0 : index
    %c0_2 = arith.constant 0 : index
    %1 = vector.load %arg2[%c0_1, %c0_2] : memref<32x4xf32, #tpu.memory_space<vmem>>, vector<32x4xf32>
    %cst = arith.constant dense<0.000000e+00> : vector<16x4xf32>
    %2 = tpu.matmul %0, %1, %cst {dimension_numbers = #tpu.dot_dimension_numbers<[1], [0], [0], [1], [0, 0, 1, 1], [], []>} : vector<16x32xf32>, vector<32x4xf32>, vector<16x4xf32> -> vector<16x4xf32>
    %cst_3 = arith.constant dense<0xFF800000> : vector<16xf32>
    %3 = vector.multi_reduction <maximumf>, %2, %cst_3 [1] : vector<16x4xf32> to vector<16xf32>
    %4 = vector.shape_cast %3 : vector<16xf32> to vector<16x1xf32>
    %5 = vector.broadcast %4 : vector<16x1xf32> to vector<16x4xf32>
    %6 = arith.subf %2, %5 : vector<16x4xf32>
    %7 = math.exp %6 : vector<16x4xf32>
    %cst_4 = arith.constant dense<0.000000e+00> : vector<16xf32>
    %8 = vector.multi_reduction <add>, %7, %cst_4 [1] : vector<16x4xf32> to vector<16xf32>
    %9 = vector.shape_cast %8 : vector<16xf32> to vector<16x1xf32>
    %10 = vector.broadcast %9 : vector<16x1xf32> to vector<16x4xf32>
    %11 = arith.divf %7, %10 : vector<16x4xf32>
    %c16_i32 = arith.constant 16 : i32
    %12 = arith.muli %arg0, %c16_i32 : i32
    %13 = tpu.iota {dimensions = array<i32: 0>} : vector<16x1xi32>
    %14 = vector.broadcast %12 : i32 to vector<16x1xi32>
    %15 = arith.addi %14, %13 : vector<16x1xi32>
    %c16_i32_5 = arith.constant 16 : i32
    %16 = vector.broadcast %c16_i32_5 : i32 to vector<16x1xi32>
    %17 = arith.cmpi slt, %15, %16 : vector<16x1xi32>
    %18 = arith.extui %17 : vector<16x1xi1> to vector<16x1xi32>
    %19 = arith.sitofp %18 : vector<16x1xi32> to vector<16x1xf32>
    %20 = vector.broadcast %19 : vector<16x1xf32> to vector<16x4xf32>
    %21 = arith.mulf %11, %20 : vector<16x4xf32>
    %cst_6 = arith.constant dense<0.000000e+00> : vector<4xf32>
    %22 = vector.multi_reduction <add>, %21, %cst_6 [0] : vector<16x4xf32> to vector<4xf32>
    %23 = vector.shape_cast %22 : vector<4xf32> to vector<1x4xf32>
    %cst_7 = arith.constant 9.99999996E-13 : f32
    %cst_8 = arith.constant 1.000000e+00 : f32
    %24 = vector.broadcast %cst_7 : f32 to vector<16x4xf32>
    %25 = arith.maximumf %24, %11 : vector<16x4xf32>
    %26 = vector.broadcast %cst_8 : f32 to vector<16x4xf32>
    %27 = arith.minimumf %26, %25 : vector<16x4xf32>
    %28 = math.log %27 : vector<16x4xf32>
    %29 = arith.mulf %11, %28 : vector<16x4xf32>
    %30 = vector.broadcast %19 : vector<16x1xf32> to vector<16x4xf32>
    %31 = arith.mulf %29, %30 : vector<16x4xf32>
    %32 = vector.shape_cast %31 : vector<16x4xf32> to vector<1x16x4xf32>
    %cst_9 = arith.constant dense<0.000000e+00> : vector<1xf32>
    %33 = vector.multi_reduction <add>, %32, %cst_9 [1, 2] : vector<1x16x4xf32> to vector<1xf32>
    %34 = vector.shape_cast %33 : vector<1xf32> to vector<1x1x1xf32>
    %35 = vector.extract %34[0, 0, 0] : f32 from vector<1x1x1xf32>
    %cst_10 = arith.constant 0.000000e+00 : f32
    %36 = arith.subf %cst_10, %35 : f32
    %cst_11 = arith.constant 0.000000e+00 : f32
    %37 = vector.broadcast %cst_11 : f32 to vector<1x124xf32>
    %38 = tpu.concatenate %23, %37 in 1 : vector<1x4xf32>, vector<1x124xf32> -> vector<1x128xf32>
    %39 = vector.broadcast %36 : f32 to vector<1x128xf32>
    %cst_12 = arith.constant 0.000000e+00 : f32
    %40 = vector.broadcast %cst_12 : f32 to vector<6x128xf32>
    %41 = tpu.concatenate %38, %39, %40 in 0 : vector<1x128xf32>, vector<1x128xf32>, vector<6x128xf32> -> vector<8x128xf32>
    %c0_13 = arith.constant 0 : index
    %c0_14 = arith.constant 0 : index
    %c0_15 = arith.constant 0 : index
    %42 = vector.load %arg6[%c0_13, %c0_14, %c0_15] : memref<1x8x128xf32, #tpu.memory_space<vmem>>, vector<1x8x128xf32>
    %43 = vector.shape_cast %42 : vector<1x8x128xf32> to vector<8x128xf32>
    %44 = vector.shape_cast %41 : vector<8x128xf32> to vector<1x8x128xf32>
    tpu.vector_store %arg6[%c0_13, %c0_14, %c0_15], %44 {strides = array<i32>} : memref<1x8x128xf32, #tpu.memory_space<vmem>>, vector<1x8x128xf32>,
    %c0_16 = arith.constant 0 : index
    %c0_17 = arith.constant 0 : index
    %45 = vector.load %arg3[%c0_16, %c0_17] : memref<32x128xf32, #tpu.memory_space<vmem>>, vector<32x128xf32>
    %cst_18 = arith.constant dense<0.000000e+00> : vector<16x128xf32>
    %46 = tpu.matmul %0, %45, %cst_18 {dimension_numbers = #tpu.dot_dimension_numbers<[1], [0], [0], [1], [0, 0, 1, 1], [], []>} : vector<16x32xf32>, vector<32x128xf32>, vector<16x128xf32> -> vector<16x128xf32>
    %47 = arith.negf %46 : vector<16x128xf32>
    %48 = math.exp %47 : vector<16x128xf32>
    %cst_19 = arith.constant 1.000000e+00 : f32
    %49 = vector.broadcast %cst_19 : f32 to vector<16x128xf32>
    %50 = arith.addf %49, %48 : vector<16x128xf32>
    %51 = arith.divf %49, %50 : vector<16x128xf32>
    %52 = arith.mulf %46, %51 : vector<16x128xf32>
    %53 = vector.shape_cast %11 : vector<16x4xf32> to vector<16x4x1xf32>
    %54 = vector.broadcast %53 : vector<16x4x1xf32> to vector<16x4x32xf32>
    %55 = vector.shape_cast %54 : vector<16x4x32xf32> to vector<16x128xf32>
    %56 = arith.mulf %52, %55 : vector<16x128xf32>
    %c0_20 = arith.constant 0 : index
    %c0_21 = arith.constant 0 : index
    %57 = vector.load %arg4[%c0_20, %c0_21] : memref<128x32xf32, #tpu.memory_space<vmem>>, vector<128x32xf32>
    %cst_22 = arith.constant dense<0.000000e+00> : vector<16x32xf32>
    %58 = tpu.matmul %56, %57, %cst_22 {dimension_numbers = #tpu.dot_dimension_numbers<[1], [0], [0], [1], [0, 0, 1, 1], [], []>} : vector<16x128xf32>, vector<128x32xf32>, vector<16x32xf32> -> vector<16x32xf32>
    %c0_23 = arith.constant 0 : index
    %c0_24 = arith.constant 0 : index
    %59 = vector.load %arg5[%c0_23, %c0_24] : memref<16x32xf32, #tpu.memory_space<vmem>>, vector<16x32xf32>
    tpu.vector_store %arg5[%c0_23, %c0_24], %58 {strides = array<i32>} : memref<16x32xf32, #tpu.memory_space<vmem>>, vector<16x32xf32>,
    return
  }
  func.func @transform_0(%arg0: i32) -> (i32, i32) {
    %c0_i32 = arith.constant 0 : i32
    %c0_i32_0 = arith.constant 0 : i32
    return %arg0, %c0_i32 : i32, i32
  }
  func.func @transform_1(%arg0: i32) -> (i32, i32) {
    %c0_i32 = arith.constant 0 : i32
    %c0_i32_0 = arith.constant 0 : i32
    %c0_i32_1 = arith.constant 0 : i32
    return %c0_i32, %c0_i32_0 : i32, i32
  }
  func.func @transform_2(%arg0: i32) -> (i32, i32) {
    %c0_i32 = arith.constant 0 : i32
    %c0_i32_0 = arith.constant 0 : i32
    %c0_i32_1 = arith.constant 0 : i32
    return %c0_i32, %c0_i32_0 : i32, i32
  }
  func.func @transform_3(%arg0: i32) -> (i32, i32) {
    %c0_i32 = arith.constant 0 : i32
    %c0_i32_0 = arith.constant 0 : i32
    %c0_i32_1 = arith.constant 0 : i32
    return %c0_i32, %c0_i32_0 : i32, i32
  }
  func.func @transform_4(%arg0: i32) -> (i32, i32) {
    %c0_i32 = arith.constant 0 : i32
    %c0_i32_0 = arith.constant 0 : i32
    return %arg0, %c0_i32 : i32, i32
  }
  func.func @transform_5(%arg0: i32) -> (i32, i32, i32) {
    %c0_i32 = arith.constant 0 : i32
    %c0_i32_0 = arith.constant 0 : i32
    %c0_i32_1 = arith.constant 0 : i32
    return %arg0, %c0_i32, %c0_i32_0 : i32, i32, i32
  }
}

</mosaic_0001>

<bundles_post_ra>
// kernel: tpu_custom_call.1
= control target key start
LH: loop header
LB: loop body
LE: loop exit
PB: predicated region body
PF: predicated region fallthrough
CT: control target
= control target key end

     0   :  { %11 = vsyncpa [#allocation3], 0  ;;  %vm27_vm0 = vcmask 261120   ;;  %s1091_s0 = inlined_call_operand.vmem [shape: f32[16,32], index: 0, kind: input, shape index: {}]   ;;  %s1092_s1 = inlined_call_operand.vmem [shape: f32[32,4], index: 1, kind: input, shape index: {}]   ;;  %s1093_s2 = inlined_call_operand.vmem [shape: f32[32,128], index: 2, kind: input, shape index: {}]   ;;  %s1094_s3 = inlined_call_operand.vmem [shape: f32[128,32], index: 3, kind: input, shape index: {}]   ;;  %s1095_s4 = inlined_call_operand.hbm [shape: f32[16,32], index: 4, kind: output, shape index: {0}]   ;;  %s1096_s5 = inlined_call_operand.hbm [shape: f32[1,8,128], index: 5, kind: output, shape index: {1}]  }
   0x1   :  { %v23_v0 = vld [vmem:[%s1092_s1] sm:$0xff]  ;;  %v24_v1 = vld [vmem:[%s1092_s1 + $0x8] sm:$0xff]  ;;  %v25_v2 = vld [vmem:[%s1092_s1 + $0x10] sm:$0xff] }
   0x2   :  { %v779_v3 = vpack.c.bf16 %v24_v1, %v23_v0  ;;  %v26_v4 = vld [vmem:[%s1092_s1 + $0x18] sm:$0xff]  ;;  %v21_v5 = vld [vmem:[%s1091_s0] sm:$0xff] }
   0x3   :  { %v783_v6 = vpack.c.bf16 %v26_v4, %v25_v2  ;;  %730 = vmatprep.mubr.msk.f32.mxu1 %vm27_vm0, %v21_v5 }
   0x4   :  { %12 = vsyncpa [#allocation5], 0  ;;  %780 = vmatprep.subr.bf16.mxu1 %v779_v3  ;;  %v22_v7 = vld [vmem:[%s1091_s0 + $0x8] sm:$0xff]  ;;  %vm109_vm1 = vcmask 31744   ;;  %v188_v22 = vld [vmem:[%s1093_s2] sm:$0xff]  ;;  %v281_v30 = vlaneseq  ;;  %s908_s14 = smov 32  }
   0x5   :  { %782 = vmatpush3.bf16.msra.mxu1 %v779_v3  ;;  %v189_v23 = vld [vmem:[%s1093_s2 + $0x8] sm:$0xff]  ;;  %v190_v25 = vld [vmem:[%s1093_s2 + $0x10] sm:$0xff]  ;;  %v191_v26 = vld [vmem:[%s1093_s2 + $0x18] sm:$0xff]  ;;  %s910_s15 = smov 96   ;;  %vm555_vm2 = vcmask 523264   ;;  %vm558_vm3 = vcmask 785408  }
   0x6   :  { %784 = vmatprep.subr.bf16.mxu1 %v783_v6  ;;  %v787_v24 = vpack.c.bf16 %v189_v23, %v188_v22  ;;  %v791_v27 = vpack.c.bf16 %v191_v26, %v190_v25  ;;  %v983_v33 = vshrl.u32 %v281_v30, 7  ;;  %v570_v22 = vld [vmem:[%s1094_s3 + $0x38] sm:$0xff]  ;;  %v572_v25 = vld [vmem:[%s1094_s3 + $0x48] sm:$0xff]  ;;  %vm183_vm4 = vcmask 1040384   ;;  %s911_s18 = smov [#allocation4]  }
   0x7   :  { %s674_s19 = sshll.u32 %s911_s18, 4  ;;  %vm185_vm5 = vcmask 1041408   ;;  %s675_s19 = int_to_ptr.vmem [resolvable:$true] %s674_s19 }
   0x8   :  { %v290_v36 = vsub.s32 1, %v983_v33  ;;  %v283_v37 = vsub.s32 0, %v983_v33  ;;  %v304_v41 = vsub.s32 3, %v983_v33  ;;  %v297_v42 = vsub.s32 2, %v983_v33  ;;  %s858_s20 = scalar_lea.vmem %s675_s19, 128  ;;  %p863_p1 = scmp.lt.s32.totalorder %s675_s19, %s675_s19 }
   0x9   :  { %786 = vmatpush3.bf16.msra.mxu1 %v783_v6  ;;  %v318_v51 = vsub.s32 5, %v983_v33  ;;  %v311_v52 = vsub.s32 4, %v983_v33  ;;  %v325_v62 = vsub.s32 6, %v983_v33  ;;  %p859_p0 = scmp.ne.s32.totalorder %s675_s19, %s858_s20  ;;  %p864_p2 = scmp.lt.s32.totalorder %s858_s20, %s858_s20 }
   0xa   :  { %788 = vmatprep.subr.bf16.mxu1 %v787_v24 }
   0xb   :  { %p865_p3 = por %p864_p2, %p863_p1 }
   0xc   :  { %731 = vmatmul.mubr.msk.f32.vlgmr.msra.gmra.mrb[0].mxu1 %vm27_vm0, %v22_v7 }
   0xd   :  { %741 = vmatprep.mubr.msk.f32.mxu1 %vm27_vm0, %v21_v5  ;;  %790 = vmatpush3.bf16.msra.mxu1 %v787_v24  ;;  %v571_v24 = vld [vmem:[%s1094_s3 + $0x40] sm:$0xff]  ;;  %p866_p4 = pnand %p865_p3, %p859_p0 }
   0xe   :  { %792 = vmatprep.subr.bf16.mxu1 %v791_v27  ;;  %v811_v26 = vpack.c.bf16 %v572_v25, %v571_v24 }
  0x11   :  { %794 = vmatpush3.bf16.msra.mxu1 %v791_v27 }
  0x14   :  { %742 = vmatmul.mubr.msk.f32.vlgmr.msra.gmra.mrb[2].mxu1 %vm27_vm0, %v22_v7 }
  0xdf   :  { %v732_v8 = vpop.f32.mrb[0].mxu1 }
  0xe0   :  { %v100_v9 = vpop.f32.mrb[1].mxu1  ;;  %v113_v11 = vsel %vm109_vm1, %v732_v8, -inf }
  0xe1   :  { %v110_v10 = vsel %vm109_vm1, %v100_v9, -inf }
  0xe2   :  { %111 = vmax.xlane.f32.xlu0 %v110_v10 }
  0xe6   :  { %114 = vmax.xlane.f32.xlu0 %v113_v11 }
  0xe7   :  { %v1031_v27 = vpop.f32.mrb[2].mxu1 }
 0x16f   :  { %v112_v12 = vpop.xlane.xlu0 %111 }
 0x170   :  { %v116_v13 = vsub.f32 %v100_v9, %v112_v12  ;;  %v332_v9 = vsub.s32 7, %v983_v33  ;;  %v563_v12 = vld [vmem:[%s1094_s3] sm:$0xff] }
 0x172   :  { %v118_v14 = vmul.f32 1.442695, %v116_v13  ;;  %v564_v13 = vld [vmem:[%s1094_s3 + $0x8] sm:$0xff] }
 0x173   :  { %v115_v15 = vpop.xlane.xlu0 %114 }
 0x174   :  { %838 = vpow2.f32 %v118_v14  ;;  %v117_v16 = vsub.f32 %v732_v8, %v115_v15  ;;  %v565_v14 = vld [vmem:[%s1094_s3 + $0x10] sm:$0xff]  ;;  %v795_v15 = vpack.c.bf16 %v564_v13, %v563_v12 }
 0x176   :  { %v120_v17 = vmul.f32 1.442695, %v117_v16  ;;  %v566_v16 = vld [vmem:[%s1094_s3 + $0x18] sm:$0xff]  ;;  %796 = vmatprep.subr.bf16.mxu0 %v795_v15 }
 0x177   :  { %798 = vmatpush3.bf16.msra.mxu0 %v795_v15 }
 0x178   :  { %840 = vpow2.f32 %v120_v17  ;;  %v799_v17 = vpack.c.bf16 %v566_v16, %v565_v14 }
 0x17a   :  { %800 = vmatprep.subr.bf16.mxu0 %v799_v17 }
 0x17b   :  { %802 = vmatpush3.bf16.msra.mxu0 %v799_v17 }
 0x17e   :  { %v839_v18 = vpop.eup %838 }
 0x17f   :  { %v122_v19 = vsel %vm109_vm1, %v839_v18, 0.0 }
 0x180   :  { %123 = vadd.xlane.f32.xlu1 %v122_v19  ;;  %v568_v19 = vld [vmem:[%s1094_s3 + $0x28] sm:$0xff] }
 0x182   :  { %v841_v20 = vpop.eup %840 }
 0x183   :  { %v125_v21 = vsel %vm109_vm1, %v841_v20, 0.0 }
 0x184   :  { %126 = vadd.xlane.f32.xlu1 %v125_v21  ;;  %v569_v21 = vld [vmem:[%s1094_s3 + $0x30] sm:$0xff] }
 0x185   :  { %v807_v23 = vpack.c.bf16 %v570_v22, %v569_v21 }
 0x20d   :  { %v124_v28 = vpop.xlane.xlu1 %123 }
 0x20e   :  { %842 = vrcp.f32 %v124_v28  ;;  %v1033_v28 = vpop.f32.mrb[3].mxu1 }
 0x211   :  { %v127_v29 = vpop.xlane.xlu1 %126 }
 0x212   :  { %844 = vrcp.f32 %v127_v29 }
 0x218   :  { %v843_v31 = vpop.eup %842 }
 0x219   :  { %v129_v32 = vmul.f32 %v843_v31, %v839_v18  ;;  %v567_v18 = vld [vmem:[%s1094_s3 + $0x20] sm:$0xff] }
 0x21b   :  { %v156_v38 = vmax.f32 %v129_v32, 1e-12  ;;  %v147_v43 = vsel %vm109_vm1, %v129_v32, 0.0  ;;  %v291_v55 = vrot.slane %v129_v32, %v290_v36  ;;  %v284_v56 = vrot.slane %v129_v32, %v283_v37 }
 0x21c   :  { %v845_v34 = vpop.eup %844  ;;  %v298_v60 = vrot.slane %v129_v32, %v297_v42  ;;  %v312_v61 = vrot.slane %v129_v32, %v311_v52  ;;  %v305_v2 = vrot.slane %v129_v32, %v304_v41  ;;  %v326_v3 = vrot.slane %v129_v32, %v325_v62 }
 0x21d   :  { %v131_v35 = vmul.f32 %v845_v34, %v841_v20  ;;  %v158_v45 = vmin.f32 %v156_v38, 1.0  ;;  %v319_v7 = vrot.slane %v129_v32, %v318_v51  ;;  %v333_v10 = vrot.slane %v129_v32, %v332_v9 }
 0x21e   :  { %v803_v20 = vpack.c.bf16 %v568_v19, %v567_v18  ;;  %v577_v18 = vld [vmem:[%s1094_s3 + $0x70] sm:$0xff]  ;;  %v578_v19 = vld [vmem:[%s1094_s3 + $0x78] sm:$0xff] }
 0x21f   :  { %v347_v39 = vrot.slane %v131_v35, %v290_v36  ;;  %v340_v40 = vrot.slane %v131_v35, %v283_v37  ;;  %v157_v44 = vmax.f32 %v131_v35, 1e-12  ;;  %v148_v46 = vsel %vm109_vm1, %v131_v35, 0.0 }
 0x220   :  { %v991_v47 = vadd.f32 %v148_v46, %v147_v43  ;;  %v361_v48 = vrot.slane %v131_v35, %v304_v41  ;;  %v354_v49 = vrot.slane %v131_v35, %v297_v42  ;;  %846 = vlog2.f32 %v158_v45  ;;  %804 = vmatprep.subr.bf16.mxu0 %v803_v20 }
 0x221   :  { %349 = vbcast.lane.b32.xlu1 %v347_v39, 256  ;;  %342 = vbcast.lane.b32.xlu0 %v340_v40, 256  ;;  %v159_v50 = vmin.f32 %v157_v44, 1.0  ;;  %v375_v53 = vrot.slane %v131_v35, %v318_v51  ;;  %v368_v54 = vrot.slane %v131_v35, %v311_v52  ;;  %v382_v8 = vrot.slane %v131_v35, %v325_v62 }
 0x222   :  { %v389_v11 = vrot.slane %v131_v35, %v332_v9  ;;  %806 = vmatpush3.bf16.msra.mxu0 %v803_v20  ;;  %v906_v40 = vmov 1983009808  }
 0x223   :  { %848 = vlog2.f32 %v159_v50  ;;  %808 = vmatprep.subr.bf16.mxu0 %v807_v23  ;;  %v395_v41 = vunpack.c.l.s4 %v906_v40  ;;  %v907_v50 = vmov 1934713408  }
 0x224   :  { %v428_v51 = vunpack.c.l.s4 %v907_v50 }
 0x225   :  { %363 = vbcast.lane.b32.xlu1 %v361_v48, 256  ;;  %356 = vbcast.lane.b32.xlu0 %v354_v49, 256  ;;  %v396_v43 = vunpack.c.0.s8 %v395_v41 }
 0x226   :  { %810 = vmatpush3.bf16.msra.mxu0 %v807_v23  ;;  %v823_v23 = vpack.c.bf16 %v578_v19, %v577_v18 }
 0x227   :  { %812 = vmatprep.subr.bf16.mxu0 %v811_v26  ;;  %v399_v48 = vsub.s32 %v396_v43, %v983_v33  ;;  %v690_v43 = vmul.f32 -1.442695, %v1033_v28 }
 0x229   :  { %377 = vbcast.lane.b32.xlu1 %v375_v53, 256  ;;  %370 = vbcast.lane.b32.xlu0 %v368_v54, 256  ;;  %v573_v54 = vld [vmem:[%s1094_s3 + $0x50] sm:$0xff]  ;;  %850 = vpow2.f32 %v690_v43 }
 0x22a   :  { %v847_v57 = vpop.eup %846  ;;  %814 = vmatpush3.bf16.msra.mxu0 %v811_v26 }
 0x22b   :  { %v161_v58 = vmul.f32 0.6931472, %v847_v57 }
 0x22d   :  { %293 = vbcast.lane.b32.xlu1 %v291_v55, 256  ;;  %286 = vbcast.lane.b32.xlu0 %v284_v56, 256  ;;  %v849_v59 = vpop.eup %848  ;;  %v164_v0 = vmul.f32 %v161_v58, %v129_v32  ;;  %v574_v55 = vld [vmem:[%s1094_s3 + $0x58] sm:$0xff] }
 0x22e   :  { %v163_v63 = vmul.f32 0.6931472, %v849_v59  ;;  %v815_v59 = vpack.c.bf16 %v574_v55, %v573_v54 }
 0x22f   :  { %v168_v4 = vsel %vm109_vm1, %v164_v0, 0.0 }
 0x230   :  { %v165_v1 = vmul.f32 %v163_v63, %v131_v35  ;;  %v429_v63 = vunpack.c.0.s8 %v428_v51  ;;  %816 = vmatprep.subr.bf16.mxu0 %v815_v59 }
 0x231   :  { %300 = vbcast.lane.b32.xlu1 %v298_v60, 256  ;;  %314 = vbcast.lane.b32.xlu0 %v312_v61, 256 }
 0x232   :  { %v169_v5 = vsel %vm109_vm1, %v165_v1, 0.0  ;;  %818 = vmatpush3.bf16.msra.mxu0 %v815_v59  ;;  %v432_v14 = vsub.s32 %v429_v63, %v983_v33 }
 0x233   :  { %v998_v6 = vadd.f32 %v169_v5, %v168_v4  ;;  %v576_v4 = vld [vmem:[%s1094_s3 + $0x68] sm:$0xff] }
 0x235   :  { %307 = vbcast.lane.b32.xlu1 %v305_v2, 256  ;;  %328 = vbcast.lane.b32.xlu0 %v326_v3, 256  ;;  %v575_v3 = vld [vmem:[%s1094_s3 + $0x60] sm:$0xff]  ;;  %s909_s3 = smov 64  }
 0x236   :  { %v819_v9 = vpack.c.bf16 %v576_v4, %v575_v3 }
 0x238   :  { %820 = vmatprep.subr.bf16.mxu0 %v819_v9 }
 0x239   :  { %321 = vbcast.lane.b32.xlu1 %v319_v7, 256  ;;  %384 = vbcast.lane.b32.xlu0 %v382_v8, 256 }
 0x23a   :  { %822 = vmatpush3.bf16.msra.mxu0 %v819_v9 }
 0x23b   :  { %824 = vmatprep.subr.bf16.mxu0 %v823_v23 }
 0x23d   :  { %335 = vbcast.lane.b32.xlu1 %v333_v10, 256 }
 0x23e   :  { %826 = vmatpush3.bf16.msra.mxu0 %v823_v23 }
 0x241   :  { %391 = vbcast.lane.b32.xlu1 %v389_v11, 256 }
 0x293   :  { %v350_v29 = vpop.permute.xlu1 %349  ;;  %v343_v30 = vpop.permute.xlu0 %342 }
 0x297   :  { %v364_v31 = vpop.permute.xlu1 %363  ;;  %v357_v32 = vpop.permute.xlu0 %356 }
 0x298   :  { %v469_v52 = vcombine.low %v350_v29, %v364_v31  ;;  %v461_v53 = vcombine.low %v343_v30, %v357_v32 }
 0x29a   :  { %v476_v0 = vrot.slane %v469_v52, %v399_v48  ;;  %v468_v1 = vrot.slane %v461_v53, %v399_v48 }
 0x29b   :  { %v378_v34 = vpop.permute.xlu1 %377  ;;  %v371_v35 = vpop.permute.xlu0 %370 }
 0x29c   :  { %v493_v15 = vcombine.low %v468_v1, %v476_v0  ;;  %v494_v30 = vcombine.high %v468_v1, %v476_v0 }
 0x29e   :  { %v501_v32 = vrot.slane %v493_v15, %v432_v14 }
 0x29f   :  { %v294_v36 = vpop.permute.xlu1 %293  ;;  %v287_v37 = vpop.permute.xlu0 %286 }
 0x2a3   :  { %v301_v38 = vpop.permute.xlu1 %300  ;;  %v315_v39 = vpop.permute.xlu0 %314 }
 0x2a4   :  { %v393_v49 = vcombine.low %v287_v37, %v301_v38 }
 0x2a6   :  { %v400_v61 = vrot.slane %v393_v49, %v399_v48 }
 0x2a7   :  { %v308_v42 = vpop.permute.xlu1 %307  ;;  %v329_v44 = vpop.permute.xlu0 %328 }
 0x2a8   :  { %v401_v45 = vcombine.low %v294_v36, %v308_v42  ;;  %v409_v57 = vcombine.low %v315_v39, %v329_v44  ;;  %v508_v39 = vrot.slane %v494_v30, %v432_v14  ;;  %v691_v44 = vmul.f32 -1.442695, %v1031_v27 }
 0x2aa   :  { %v408_v56 = vrot.slane %v401_v45, %v399_v48  ;;  %v416_v7 = vrot.slane %v409_v57, %v399_v48  ;;  %852 = vpow2.f32 %v691_v44  ;;  %v851_v45 = vpop.eup %850 }
 0x2ab   :  { %v322_v46 = vpop.permute.xlu1 %321  ;;  %v385_v58 = vpop.permute.xlu0 %384 }
 0x2ac   :  { %v477_v2 = vcombine.low %v371_v35, %v385_v58  ;;  %v425_v5 = vcombine.low %v400_v61, %v408_v56  ;;  %v426_v16 = vcombine.high %v400_v61, %v408_v56 }
 0x2ae   :  { %v484_v17 = vrot.slane %v477_v2, %v399_v48  ;;  %v433_v21 = vrot.slane %v425_v5, %v432_v14  ;;  %v440_v31 = vrot.slane %v426_v16, %v432_v14 }
 0x2af   :  { %v336_v60 = vpop.permute.xlu1 %335 }
 0x2b0   :  { %v417_v62 = vcombine.low %v322_v46, %v336_v60  ;;  %v273_v46 = vadd.f32 1.0, %v851_v45 }
 0x2b2   :  { %v424_v8 = vrot.slane %v417_v62, %v399_v48  ;;  %854 = vrcp.f32 %v273_v46 }
 0x2b3   :  { %v392_v10 = vpop.permute.xlu1 %391 }
 0x2b4   :  { %v441_v11 = vcombine.low %v416_v7, %v424_v8  ;;  %v442_v12 = vcombine.high %v416_v7, %v424_v8  ;;  %v485_v13 = vcombine.low %v378_v34, %v392_v10  ;;  %v150_v10 = vrot.slane %v991_v47, 4 }
 0x2b6   :  { %v492_v20 = vrot.slane %v485_v13, %v399_v48  ;;  %v449_v22 = vrot.slane %v441_v11, %v432_v14  ;;  %v456_v26 = vrot.slane %v442_v12, %v432_v14  ;;  %v853_v48 = vpop.eup %852  ;;  %v151_v11 = vadd.f32 %v150_v10, %v991_v47 }
 0x2b7   :  { %v274_v49 = vadd.f32 1.0, %v853_v48 }
 0x2b8   :  { %v509_v24 = vcombine.low %v484_v17, %v492_v20  ;;  %v510_v25 = vcombine.high %v484_v17, %v492_v20  ;;  %v458_v33 = vcombine.high %v433_v21, %v449_v22  ;;  %v457_v29 = vcombine.low %v433_v21, %v449_v22 }
 0x2b9   :  { %v459_v35 = vcombine.low %v440_v31, %v456_v26  ;;  %v460_v40 = vcombine.high %v440_v31, %v456_v26  ;;  %856 = vrcp.f32 %v274_v49  ;;  %v152_v12 = vrot.slane %v151_v11, 2 }
 0x2ba   :  { %531 = vrot.lane.b32.xlu0 %v458_v33, %s908_s14  ;;  %v517_v34 = vrot.slane %v509_v24, %v432_v14  ;;  %v524_v37 = vrot.slane %v510_v25, %v432_v14 }
 0x2bc   :  { %v526_v36 = vcombine.high %v501_v32, %v517_v34  ;;  %v525_v38 = vcombine.low %v501_v32, %v517_v34  ;;  %v527_v41 = vcombine.low %v508_v39, %v524_v37  ;;  %v528_v42 = vcombine.high %v508_v39, %v524_v37  ;;  %v855_v53 = vpop.eup %854 }
 0x2bd   :  { %v279_v54 = vmul.f32 %v855_v53, %v1033_v28 }
 0x2be   :  { %539 = vrot.lane.b32.xlu0 %v459_v35, %s909_s3  ;;  %533 = vrot.lane.b32.xlu1 %v526_v36, %s908_s14 }
 0x2c2   :  { %547 = vrot.lane.b32.xlu0 %v460_v40, %s910_s15  ;;  %541 = vrot.lane.b32.xlu1 %v527_v41, %s909_s3 }
 0x2c3   :  { %v857_v58 = vpop.eup %856 }
 0x2c4   :  { %v280_v62 = vmul.f32 %v857_v58, %v1031_v27  ;;  %v153_v27 = vadd.f32 %v152_v12, %v151_v11 }
 0x2c6   :  { %549 = vrot.lane.b32.xlu1 %v528_v42, %s910_s15  ;;  %v154_v13 = vrot.slane %v153_v27, 1 }
 0x2c8   :  { %v155_v14 = vadd.f32 %v154_v13, %v153_v27 }
 0x2ca   :  { %v181_v15 = vsel %vm109_vm1, %v155_v14, 0.0 }
 0x2e1   :  { %171 = vadd.xlane.f32.xlu0 %v998_v6 }
 0x32c   :  { %v532_v50 = vpop.permute.xlu0 %531 }
 0x32d   :  { %v553_v6 = vsel %vm27_vm0, %v457_v29, %v532_v50 }
 0x330   :  { %v534_v51 = vpop.permute.xlu1 %533  ;;  %v540_v52 = vpop.permute.xlu0 %539 }
 0x331   :  { %v556_v55 = vsel %vm555_vm2, %v553_v6, %v540_v52  ;;  %v554_v61 = vsel %vm27_vm0, %v525_v38, %v534_v51 }
 0x334   :  { %v542_v56 = vpop.permute.xlu1 %541  ;;  %v548_v57 = vpop.permute.xlu0 %547 }
 0x335   :  { %v559_v59 = vsel %vm558_vm3, %v556_v55, %v548_v57  ;;  %v557_v63 = vsel %vm555_vm2, %v554_v61, %v542_v56 }
 0x336   :  { %v561_v60 = vmul.f32 %v559_v59, %v279_v54 }
 0x338   :  { %v550_v0 = vpop.permute.xlu1 %549  ;;  %776 = vmatprep.mubr.f32.mxu0 %v561_v60 }
 0x339   :  { %v560_v1 = vsel %vm558_vm3, %v557_v63, %v550_v0 }
 0x33a   :  { %v562_v2 = vmul.f32 %v560_v1, %v280_v62 }
 0x33c   :  { %777 = vmatmul.mubr.f32.vlgmr.msra.gmra.mrb[0].mxu0 %v562_v2 }
 0x36e   :  { %v172_v3 = vpop.xlane.xlu0 %171 }
 0x36f   :  { %v173_v4 = vrot.slane %v172_v3, 4 }
 0x371   :  { %v174_v5 = vadd.f32 %v173_v4, %v172_v3 }
 0x373   :  { %v175_v28 = vrot.slane %v174_v5, 2 }
 0x375   :  { %v176_v7 = vadd.f32 %v175_v28, %v174_v5 }
 0x377   :  { %v177_v8 = vrot.slane %v176_v7, 1 }
 0x379   :  { %v178_v9 = vadd.f32 %v177_v8, %v176_v7 }
 0x37b   :  { %827 = vpush %v178_v9 }
 0x3ac   :  { %s828_s16 = spop %827 }
 0x3ad   :  { %s180_s17 = ssub.f32 0.0, %s828_s16 }
 0x3af   :  { %v182_v16 = vstv %s180_s17 }
 0x3b0   :  { %v184_v17 = vsel %vm183_vm4, %v181_v15, %v182_v16 }
 0x3b1   :  { %v186_v18 = vsel %vm185_vm5, %v184_v17, 0.0 }
 0x3b2   :  { %187 = vst [vmem:[#allocation4] sm:$0xff] %v186_v18 }
 0x3b3   :  { %869 = shalt.err (!%p866_p4)
}
 0x3b4   :  { %s870_s23 = scalar_lea.hbm %s1096_s5, 128 }
 0x3b5   :  { %p871_p5 = scmp.ne.s32.totalorder %s1096_s5, %s870_s23  ;;  %p874_p6 = scmp.lt.u32.totalorder %s870_s23, %s1096_s5 }
 0x3b7   :  { %p876_p7 = pnand %p874_p6, %p871_p5 }
 0x3b9   :  { %879 = shalt.err (!%p876_p7)
}
 0x3ba   :  { %677 = dma.vmem_to_hbm [thread:$0]  %s675_s19, 128, %s1096_s5, [#allocation5]  }
 0x3bb   :  { %s912_s0 = smov [#allocation2]  }
 0x3bc   :  { %s661_s1 = sshll.u32 %s912_s0, 4  ;;  %s662_s1 = int_to_ptr.vmem [resolvable:$true] %s661_s1 }
 0x3bd   :  { %s880_s30 = scalar_lea.vmem %s662_s1, 256  ;;  %p885_p9 = scmp.lt.s32.totalorder %s662_s1, %s662_s1 }
 0x3be   :  { %p881_p8 = scmp.ne.s32.totalorder %s662_s1, %s880_s30  ;;  %p886_p10 = scmp.lt.s32.totalorder %s880_s30, %s880_s30 }
 0x3c0   :  { %p887_p11 = por %p886_p10, %p885_p9 }
 0x3c2   :  { %p888_p12 = pnand %p887_p11, %p881_p8 }
 0x40f   :  { %v778_v47 = vpop.f32.mrb[0].mxu0 }
 0x410   :  { %655 = vst.msk [vmem:[#allocation2 + $0x8] sm:$0xff] %vm27_vm0, %v778_v47  ;;  %v645_v19 = vpop.f32.mrb[1].mxu0 }
 0x411   :  { %654 = vst.msk [vmem:[#allocation2] sm:$0xff] %vm27_vm0, %v645_v19 }
 0x412   :  { %891 = shalt.err (!%p888_p12)
}
 0x413   :  { %s892_s5 = scalar_lea.hbm %s1095_s4, 256 }
 0x414   :  { %p893_p13 = scmp.ne.s32.totalorder %s1095_s4, %s892_s5  ;;  %p896_p0 = scmp.lt.u32.totalorder %s892_s5, %s1095_s4 }
 0x416   :  { %p898_p1 = pnand %p896_p0, %p893_p13 }
 0x418   :  { %901 = shalt.err (!%p898_p1)
}
 0x419   :  { %s913_s11 = smov 128   ;;  %s914_s12 = smov 8  }
 0x41a   :  { %667 = dma.vmem_to_hbm [thread:$0]  %s662_s1, 256, %s1095_s4, [#allocation3], %s913_s11, %s913_s11, %s914_s12  }
 0x41b   :  { %902 = dma.done.wait [#allocation3], 256  }
 0x41c   :  { %903 = vsyncadd [#allocation3], 4294967040 }
 0x41d   :  { %904 = dma.done.wait [#allocation5], 128  }
 0x41e   :  { %905 = vsyncadd [#allocation5], 4294967168 }
 0x41f   :  { %684 = vsyncpa [#allocation3], 1 }
 0x420   :  { %685 = vsyncpa [#allocation5], 1 }

</bundles_post_ra>
